<compile_context>
chip_gen: v7x
topology: tpu7x:2x2x1
jax: 0.10.0
libtpu: 0.0.40
codegen_flags: <defaults>
</compile_context>

<pallas_src>
import jax
import jax.numpy as jnp
from jax.experimental import pallas as pl
from jax.experimental.pallas import tpu as pltpu

M_TILE = 8  # f32 sublane tile; only row 0 carries real data


def arcface_embed_kernel(x_ref, w_ref, b_ref, o_ref):
    # x_ref: [M_TILE, tk] f32    w_ref: [tk, D_pad] bf16
    # b_ref: [1, D_pad]   f32    o_ref: [M_TILE, D_pad] f32 (resident over K)
    k = pl.program_id(0)

    @pl.when(k == 0)
    def _():
        o_ref[...] = jnp.zeros_like(o_ref)

    # Accumulate directly into the resident output block (f32 on the MXU path).
    o_ref[...] += jnp.dot(
        x_ref[...].astype(jnp.bfloat16),
        w_ref[...],
        preferred_element_type=jnp.float32,
    )

    @pl.when(k == pl.num_programs(0) - 1)
    def _():
        emb = o_ref[...] + b_ref[...]                       # bias, f32
        sq = jnp.sum(emb * emb, axis=-1, keepdims=True)     # ||emb||^2 (XLU)
        inv_norm = jax.lax.rsqrt(sq + jnp.float32(1e-12))   # EUP rsqrt
        o_ref[...] = emb * inv_norm                         # normed_embedding


def prepare_arcface_head(w, b, *, tk_max=8192):
    """One-time (model-load) preparation of the embedding head.

    Casts W to bf16 and pads it to (K_pad, D_pad); picks a K tile `tk` that is
    a multiple of 128, divides K_pad exactly (no wasted zero-row DMA) and is
    capped at tk_max (VMEM-safe on every generation incl. v7x).
    """
    K, D = w.shape
    D_pad = pl.cdiv(D, 128) * 128
    K_pad = pl.cdiv(K, 128) * 128          # minimal lane/sublane-aligned K
    n128 = K_pad // 128

    # Largest tk (multiple of 128) that divides K_pad and is <= tk_max.
    max_units = max(1, tk_max // 128)
    tk_units = 1
    for u in range(1, max_units + 1):
        if n128 % u == 0:
            tk_units = u
    tk = tk_units * 128

    w_p = (
        jnp.zeros((K_pad, D_pad), jnp.bfloat16)
        .at[:K, :D]
        .set(w.astype(jnp.bfloat16))
    )
    b_p = jnp.zeros((1, D_pad), jnp.float32).at[0, :D].set(b.astype(jnp.float32))

    return {
        "w": w_p, "b": b_p,
        "K": K, "D": D, "K_pad": K_pad, "D_pad": D_pad, "tk": tk,
    }


def arcface_feature_extractor(x_nchw, head):
    """Returns the L2-normalized embedding of the first 'face' (image 0),
    matching `faces[0].normed_embedding` of the PyTorch module."""
    K, D = head["K"], head["D"]
    K_pad, D_pad, tk = head["K_pad"], head["D_pad"], head["tk"]
    n_k = K_pad // tk

    N = x_nchw.shape[0]
    # faces[0] -> only row 0 is ever returned; don't compute the others.
    x_row = x_nchw.reshape(N, -1)[0].astype(jnp.float32)
    x_p = jnp.zeros((M_TILE, K_pad), jnp.float32).at[0, :K].set(x_row)

    # Explicit scoped-VMEM budget: double-buffered streams + resident output.
    vmem_bytes = (
        2 * tk * D_pad * 2          # W double buffer (bf16)
        + 2 * M_TILE * tk * 4       # x double buffer (f32)
        + 2 * 1 * D_pad * 4         # bias
        + 2 * M_TILE * D_pad * 4    # output (resident accumulator)
    )
    vmem_limit = int(min(vmem_bytes + (8 << 20), 64 << 20))

    cost = pl.CostEstimate(
        flops=2 * M_TILE * K_pad * D_pad,
        transcendentals=M_TILE,
        bytes_accessed=K_pad * D_pad * 2 + M_TILE * K_pad * 4 + M_TILE * D_pad * 4,
    )

    out = pl.pallas_call(
        arcface_embed_kernel,
        out_shape=jax.ShapeDtypeStruct((M_TILE, D_pad), jnp.float32),
        grid_spec=pltpu.PrefetchScalarGridSpec(
            num_scalar_prefetch=0,
            grid=(n_k,),
            in_specs=[
                pl.BlockSpec((M_TILE, tk), lambda k: (0, k)),   # x row tile
                pl.BlockSpec((tk, D_pad), lambda k: (k, 0)),    # W K-stream
                pl.BlockSpec((1, D_pad), lambda k: (0, 0)),     # bias
            ],
            out_specs=pl.BlockSpec((M_TILE, D_pad), lambda k: (0, 0)),
        ),
        compiler_params=pltpu.CompilerParams(
            dimension_semantics=("arbitrary",),   # K is a reduction axis
            vmem_limit_bytes=vmem_limit,
        ),
        cost_estimate=cost,
    )(x_p, head["w"], head["b"])

    # faces[0].normed_embedding -> row 0, real D lanes only
    return out[0, :D]


if __name__ == "__main__":
    key = jax.random.PRNGKey(0)
    k_x, k_w, k_b = jax.random.split(key, 3)

    # Small shapes consistent with the forward: one NCHW image batch.
    N, C, H, W = 2, 4, 16, 16
    K = C * H * W          # 1024 flattened features
    D = 128                # embedding dim (lane-friendly)

    x = jax.random.normal(k_x, (N, C, H, W), dtype=jnp.float32)
    w = jax.random.normal(k_w, (K, D), dtype=jnp.float32) * 0.02
    b = jax.random.normal(k_b, (D,), dtype=jnp.float32) * 0.01

    # tk_max=256 -> 4 K-steps: exercises the resident-accumulator / pl.when
    # paths even at this small test size (production default is tk_max=8192).
    head = prepare_arcface_head(w, b, tk_max=256)

    emb = arcface_feature_extractor(x, head)
    emb = jax.block_until_ready(emb)

    # Reference: same bf16 weight/input quantization, f32 accumulation,
    # f32 epilogue.  (Self-consistency check; the true ArcFace model would be
    # validated offline.)
    xr = x.reshape(N, K)[0].astype(jnp.bfloat16).astype(jnp.float32)
    wr = w.astype(jnp.bfloat16).astype(jnp.float32)
    ref_emb = xr @ wr + b
    ref = ref_emb / jnp.sqrt(jnp.sum(ref_emb ** 2) + 1e-12)

    assert emb.shape == (D,)
    assert jnp.allclose(emb, ref, atol=2e-4, rtol=2e-3), "mismatch vs reference"
    assert jnp.allclose(jnp.linalg.norm(emb), 1.0, atol=1e-4)

    print("KERNEL_OK")
</pallas_src>

<mosaic_0001>
module attributes {stable_mosaic.version = 11 : i64} {
  func.func @arcface_embed_kernel(%arg0: i32, %arg1: memref<8x256xf32, #tpu.memory_space<vmem>>, %arg2: memref<256x128xbf16, #tpu.memory_space<vmem>>, %arg3: memref<1x128xf32, #tpu.memory_space<vmem>>, %arg4: memref<8x128xf32, #tpu.memory_space<vmem>>) attributes {dimension_semantics = [#tpu.dimension_semantics<arbitrary>], iteration_bounds = array<i64: 4>, scalar_prefetch = 0 : i64, scratch_operands = 0 : i64, tpu.core_type = #tpu.core_type<tc>, window_params = [{transform_indices = @transform_0, window_bounds = array<i64: 8, 256>}, {transform_indices = @transform_1, window_bounds = array<i64: 256, 128>}, {pipeline_mode = #tpu.pipeline_mode<synchronous>, transform_indices = @transform_2, window_bounds = array<i64: 1, 128>}, {pipeline_mode = #tpu.pipeline_mode<synchronous>, transform_indices = @transform_3, window_bounds = array<i64: 8, 128>}]} {
    %c0_i32 = arith.constant 0 : i32
    %0 = arith.cmpi eq, %arg0, %c0_i32 : i32
    %1 = arith.extui %0 : i1 to i32
    %c0_i32_0 = arith.constant 0 : i32
    %2 = arith.cmpi ne, %1, %c0_i32_0 : i32
    scf.if %2 {
      %cst_9 = arith.constant 0.000000e+00 : f32
      %13 = vector.broadcast %cst_9 : f32 to vector<8x128xf32>
      %c0_10 = arith.constant 0 : index
      %c0_11 = arith.constant 0 : index
      %14 = vector.load %arg4[%c0_10, %c0_11] : memref<8x128xf32, #tpu.memory_space<vmem>>, vector<8x128xf32>
      tpu.vector_store %arg4[%c0_10, %c0_11], %13 {strides = array<i32>} : memref<8x128xf32, #tpu.memory_space<vmem>>, vector<8x128xf32>,
    } else {
    }
    %c0 = arith.constant 0 : index
    %c0_1 = arith.constant 0 : index
    %3 = vector.load %arg4[%c0, %c0_1] : memref<8x128xf32, #tpu.memory_space<vmem>>, vector<8x128xf32>
    %c0_2 = arith.constant 0 : index
    %c0_3 = arith.constant 0 : index
    %4 = vector.load %arg1[%c0_2, %c0_3] : memref<8x256xf32, #tpu.memory_space<vmem>>, vector<8x256xf32>
    %5 = arith.truncf %4 : vector<8x256xf32> to vector<8x256xbf16>
    %c0_4 = arith.constant 0 : index
    %c0_5 = arith.constant 0 : index
    %6 = vector.load %arg2[%c0_4, %c0_5] : memref<256x128xbf16, #tpu.memory_space<vmem>>, vector<256x128xbf16>
    %cst = arith.constant dense<0.000000e+00> : vector<8x128xf32>
    %7 = tpu.matmul %5, %6, %cst {dimension_numbers = #tpu.dot_dimension_numbers<[1], [0], [0], [1], [0, 0, 1, 1], [], []>} : vector<8x256xbf16>, vector<256x128xbf16>, vector<8x128xf32> -> vector<8x128xf32>
    %8 = arith.addf %3, %7 : vector<8x128xf32>
    %c0_6 = arith.constant 0 : index
    %c0_7 = arith.constant 0 : index
    %9 = vector.load %arg4[%c0_6, %c0_7] : memref<8x128xf32, #tpu.memory_space<vmem>>, vector<8x128xf32>
    tpu.vector_store %arg4[%c0_6, %c0_7], %8 {strides = array<i32>} : memref<8x128xf32, #tpu.memory_space<vmem>>, vector<8x128xf32>,
    %c3_i32 = arith.constant 3 : i32
    %10 = arith.cmpi eq, %arg0, %c3_i32 : i32
    %11 = arith.extui %10 : i1 to i32
    %c0_i32_8 = arith.constant 0 : i32
    %12 = arith.cmpi ne, %11, %c0_i32_8 : i32
    scf.if %12 {
      %c0_9 = arith.constant 0 : index
      %c0_10 = arith.constant 0 : index
      %13 = vector.load %arg4[%c0_9, %c0_10] : memref<8x128xf32, #tpu.memory_space<vmem>>, vector<8x128xf32>
      %c0_11 = arith.constant 0 : index
      %c0_12 = arith.constant 0 : index
      %14 = vector.load %arg3[%c0_11, %c0_12] : memref<1x128xf32, #tpu.memory_space<vmem>>, vector<1x128xf32>
      %15 = vector.broadcast %14 : vector<1x128xf32> to vector<8x128xf32>
      %16 = arith.addf %13, %15 : vector<8x128xf32>
      %17 = arith.mulf %16, %16 : vector<8x128xf32>
      %cst_13 = arith.constant dense<0.000000e+00> : vector<8xf32>
      %18 = vector.multi_reduction <add>, %17, %cst_13 [1] : vector<8x128xf32> to vector<8xf32>
      %19 = vector.shape_cast %18 : vector<8xf32> to vector<8x1xf32>
      %cst_14 = arith.constant 9.99999996E-13 : f32
      %20 = vector.broadcast %cst_14 : f32 to vector<8x1xf32>
      %21 = arith.addf %19, %20 : vector<8x1xf32>
      %22 = math.rsqrt %21 : vector<8x1xf32>
      %23 = vector.broadcast %22 : vector<8x1xf32> to vector<8x128xf32>
      %24 = arith.mulf %16, %23 : vector<8x128xf32>
      %c0_15 = arith.constant 0 : index
      %c0_16 = arith.constant 0 : index
      %25 = vector.load %arg4[%c0_15, %c0_16] : memref<8x128xf32, #tpu.memory_space<vmem>>, vector<8x128xf32>
      tpu.vector_store %arg4[%c0_15, %c0_16], %24 {strides = array<i32>} : memref<8x128xf32, #tpu.memory_space<vmem>>, vector<8x128xf32>,
    } else {
    }
    return
  }
  func.func @transform_0(%arg0: i32) -> (i32, i32) {
    %c0_i32 = arith.constant 0 : i32
    %c0_i32_0 = arith.constant 0 : i32
    return %c0_i32, %arg0 : i32, i32
  }
  func.func @transform_1(%arg0: i32) -> (i32, i32) {
    %c0_i32 = arith.constant 0 : i32
    %c0_i32_0 = arith.constant 0 : i32
    return %arg0, %c0_i32 : i32, i32
  }
  func.func @transform_2(%arg0: i32) -> (i32, i32) {
    %c0_i32 = arith.constant 0 : i32
    %c0_i32_0 = arith.constant 0 : i32
    %c0_i32_1 = arith.constant 0 : i32
    return %c0_i32, %c0_i32_0 : i32, i32
  }
  func.func @transform_3(%arg0: i32) -> (i32, i32) {
    %c0_i32 = arith.constant 0 : i32
    %c0_i32_0 = arith.constant 0 : i32
    %c0_i32_1 = arith.constant 0 : i32
    return %c0_i32, %c0_i32_0 : i32, i32
  }
}

</mosaic_0001>

<bundles_post_ra>
// kernel: tpu_custom_call.1
= control target key start
LH: loop header
LB: loop body
LE: loop exit
PB: predicated region body
PF: predicated region fallthrough
CT: control target
= control target key end

     0   :  { %8 = vsyncpa [#allocation3], 0  ;;  %s986_s0 = inlined_call_operand.hbm [shape: f32[8,1024], index: 0, kind: input, shape index: {}]   ;;  %s987_s1 = inlined_call_operand.hbm [shape: bf16[1024,128], index: 1, kind: input, shape index: {}]   ;;  %s988_s2 = inlined_call_operand.vmem [shape: f32[1,128], index: 2, kind: input, shape index: {}]   ;;  %s989_s3 = inlined_call_operand.hbm [shape: f32[8,128], index: 3, kind: output, shape index: {}]  }
   0x1   :  { %10 = vsyncpa [#allocation3 + $0x1], 0 }
   0x2   :  { %11 = vsyncpa [#allocation6], 0 }
   0x3   :  { %13 = vsyncpa [#allocation6 + $0x1], 0 }
   0x4   :  { %14 = vsyncpa [#allocation4], 0  ;;  %s785_s12 = smov 0   ;;  %s787_s13 = smov 0  }
   0x5   :  { %s789_s14 = smov 0   ;;  %s791_s15 = smov 0  }
   0x6 LB: > { %s804_s16 = sadd.s32 4294967295, %s757_s15   ;;  %s807_s17 = sadd.s32 1, %s757_s15   ;;  %s757_s15 = sphi %s791_s15, %s1000_s15   ;;  %s753_s14 = sphi %s789_s14, %s999_s14   ;;  %s749_s13 = sphi %s787_s13, %s998_s13   ;;  %s745_s12 = sphi %s785_s12, %s997_s12  }
   0x7   : > { %s24_s18 = ssub.s32 %s757_s15, %s807_s17  ;;  %s27_s19 = sadd.s32 1, %s753_s14 }
   0x8   : > { %p25_p0 = scmp.eq.s32.totalorder %s24_s18, 0  ;;  %p34_p1 = scmp.ne.s32.totalorder %s753_s14, %s749_s13 }
   0x9   : > { %p35_p2 = scmp.eq.s32.totalorder %s757_s15, 0  ;;  %p40_p3 = scmp.ne.s32.totalorder %s749_s13, %s745_s12 }
   0xa   : > { %s817_s20 = scalar_select %p25_p0, %s753_s14, %s27_s19  }
   0xb   : > { %p36_p4 = por %p35_p2, %p34_p1  ;;  %p41_p5 = scmp.eq.s32.totalorder %s804_s16, 0 }
   0xc   : > { %p572_p6 = scmp.lt.s32.totalorder %s757_s15, 4  ;;  %s826_s22 = sand.u32 1, %s753_s14  }
   0xd   : > { %p821_p7 = por %p41_p5, %p40_p3  ;;  %s501_s23 = sshll.u32 %s826_s22, 4 }
   0xe   : > { %s533_s24 = sshll.u32 %s757_s15, 8  ;;  %s139_s28 = scalar_lea.vmem [#allocation2], %s501_s23 }
   0xf   : > { %s991_s21 = scalar_select %p821_p7, 1, 0 }
  0x10   : > { %s833_s27 = scalar_lea.hbm %s986_s0, %s533_s24  ;;  %s147_s29 = sshll.u32 %s139_s28, 4  ;;  %s835_s29 = int_to_ptr.vmem [resolvable:$true] %s147_s29 }
  0x11   : > { %p837_p8 = pnand %p572_p6, %p36_p4  ;;  %s136_s4 = scalar_lea.sflag [#allocation3], %s826_s22 }
  0x12   : > { %s629_s5 = scalar_lea.hbm %s833_s27, 256  ;;  %s634_s8 = scalar_lea.hbm %s986_s0, 1024 }
  0x13   : > { %p630_p11 = scmp.ne.s32.totalorder %s833_s27, %s629_s5  ;;  %p631_p12 = pneg %p837_p8 }
  0x14   : > { %p635_p1 = scmp.lt.u32.totalorder %s833_s27, %s986_s0  ;;  %p636_p2 = scmp.lt.u32.totalorder %s634_s8, %s629_s5 }
  0x15   : > { %p632_p13 = pnand %p631_p12, %p630_p11  ;;  %p638_p4 = scmp.lt.u32.totalorder %s629_s5, %s833_s27 }
  0x16   : > { %p637_p3 = por %p636_p2, %p635_p1 }
  0x17   : > { %p633_p0 = pneg %p632_p13 }
  0x18   : > { %p639_p5 = por %p638_p4, %p637_p3 }
  0x1a   : > { %p640_p6 = pnand %p639_p5, %p633_p0 }
  0x1c   : > { %643 = shalt.err (!%p640_p6)
}
  0x1d   : > { %s644_s11 = scalar_lea.vmem %s835_s29, 256  ;;  %s759_s12 = smov [#allocation2]  }
  0x1e   : > { %p645_p11 = scmp.ne.s32.totalorder %s835_s29, %s644_s11  ;;  %s649_s18 = sshll.u32 %s759_s12, 4  ;;  %s650_s18 = int_to_ptr.vmem [resolvable:$false] %s649_s18 }
  0x1f   : > { %s651_s19 = scalar_lea.vmem %s650_s18, 512  ;;  %p652_p10 = scmp.lt.s32.totalorder %s835_s29, %s650_s18 }
  0x20   : > { %p647_p13 = pnand %p645_p11, %p631_p12  ;;  %p653_p1 = scmp.lt.s32.totalorder %s651_s19, %s644_s11 }
  0x22   : > { %p648_p9 = pneg %p647_p13  ;;  %p654_p2 = por %p653_p1, %p652_p10 }
  0x24   : > { %p655_p3 = pnand %p654_p2, %p648_p9 }
  0x26   : > { %658 = shalt.err (!%p655_p3)
}
  0x27   : > { %568 = dma.hbm_to_vmem [thread:$0]  (!%p837_p8), %s833_s27, 256, %s835_s29, %s136_s4  }
  0x28   : > { %p993_p0 = scmp.lt.s32.totalorder %s757_s15, 5  ;;  %p994_p4 = scmp.ge.s32.totalorder %s757_s15, 1 }
  0x29   : > { %s504_s24 = sshll.u32 %s826_s22, 7  ;;  %s534_s25 = sshll.u32 %s757_s15, 11 }
  0x2a   : > { %p873_p5 = pnand %p994_p4, %p993_p0  ;;  %s882_s5 = scalar_lea.hbm %s987_s1, %s534_s25 }
  0x2b   : > { %s158_s6 = scalar_lea.vmem [#allocation5], %s504_s24  ;;  %s155_s27 = scalar_lea.sflag [#allocation6], %s826_s22 }
  0x2c   : > { %s165_s7 = sshll.u32 %s158_s6, 4  ;;  %s659_s29 = scalar_lea.hbm %s882_s5, 2048  ;;  %s884_s7 = int_to_ptr.vmem [resolvable:$true] %s165_s7 }
  0x2d   : > { %p660_p9 = scmp.ne.s32.totalorder %s882_s5, %s659_s29  ;;  %s664_s8 = scalar_lea.hbm %s987_s1, 8192 }
  0x2e   : > { %p665_p11 = scmp.lt.u32.totalorder %s882_s5, %s987_s1  ;;  %p666_p13 = scmp.lt.u32.totalorder %s664_s8, %s659_s29 }
  0x2f   : > { %p662_p10 = pnand %p660_p9, %p631_p12  ;;  %p668_p2 = scmp.lt.u32.totalorder %s659_s29, %s882_s5 }
  0x30   : > { %p667_p1 = por %p666_p13, %p665_p11 }
  0x31   : > { %p663_p6 = pneg %p662_p10 }
  0x32   : > { %p669_p3 = por %p668_p2, %p667_p1 }
  0x34   : > { %p670_p0 = pnand %p669_p3, %p663_p6 }
  0x36   : > { %673 = shalt.err (!%p670_p0)
}
  0x37   : > { %s674_s11 = scalar_lea.vmem %s884_s7, 2048  ;;  %s760_s12 = smov [#allocation5]  }
  0x38   : > { %p675_p4 = scmp.ne.s32.totalorder %s884_s7, %s674_s11  ;;  %s679_s18 = sshll.u32 %s760_s12, 4  ;;  %s680_s18 = int_to_ptr.vmem [resolvable:$false] %s679_s18 }
  0x39   : > { %s681_s19 = scalar_lea.vmem %s680_s18, 4096  ;;  %p682_p7 = scmp.lt.s32.totalorder %s884_s7, %s680_s18 }
  0x3a   : > { %p677_p9 = pnand %p675_p4, %p631_p12  ;;  %p683_p11 = scmp.lt.s32.totalorder %s681_s19, %s674_s11 }
  0x3c   : > { %p678_p10 = pneg %p677_p9  ;;  %p684_p13 = por %p683_p11, %p682_p7 }
  0x3e   : > { %p685_p1 = pnand %p684_p13, %p678_p10 }
  0x40   : > { %688 = shalt.err (!%p685_p1)
}
  0x41   : > { %s761_s24 = smov 64   ;;  %s762_s25 = smov 4  }
  0x42   : > { %571 = dma.hbm_to_vmem [thread:$0]  (!%p837_p8), %s882_s5, 2048, %s884_s7, %s155_s27, %s761_s24, %s761_s24, %s762_s25  }
  0x43   : > { %177 = sbr.rel (%p873_p5) target bundleno = 532 (0x214), region = 32  ;;  %s179_s26 = sand.u32 (!%p873_p5), 1, %s749_s13  }
  0x44   : > { %s508_s28 = sshll.u32 (!%p873_p5), %s179_s26, 4  ;;  %s180_s6 = scalar_lea.sflag (!%p873_p5), [#allocation3], %s179_s26 }
  0x45   : > { %s915_s29 = scalar_lea.vmem (!%p873_p5), [#allocation2], %s508_s28  ;;  %p996_p7 = scmp.ne.s32.totalorder (!%p873_p5), %s991_s21, 0 }
  0x4a   : > { %732 = dma.done.wait (%p996_p7), %s180_s6, 256  }
  0x4b   : > { %734 = vsyncadd (%p996_p7), %s180_s6, 4294967040  ;;  %s509_s15 = sshll.u32 %s179_s26, 7  ;;  %s189_s30 = scalar_lea.sflag [#allocation6], %s179_s26 }
  0x4c   : > { %s921_s22 = scalar_lea.vmem [#allocation5], %s509_s15 }
  0x4d   : > { %736 = dma.done.wait (%p996_p7), %s189_s30, 2048  }
  0x4e   : > { %738 = vsyncadd (%p996_p7), %s189_s30, 4294965248  ;;  %p510_p8 = scmp.ne.s32.totalorder %s804_s16, 0 }
  0x4f   : > { %v763_v0 = vmov (!%p510_p8), 0.0  }
  0x50   : > { %221 = sbr.rel (%p510_p8) target bundleno = 87 (0x57), region = 44  ;;  %222 = vst [vmem:[#allocation7] sm:$0xff] (!%p510_p8), %v763_v0 }
  0x57 PF: > { %v611_v1 = vld [vmem:[%s921_s22 + $0x40] sm:$0xff]   ;;  %v613_v3 = vld [vmem:[%s921_s22 + $0x48] sm:$0xff]   ;;  %v615_v5 = vld [vmem:[%s921_s22 + $0x50] sm:$0xff]   ;;  %p527_p12 = scmp.ne.s32.totalorder %s804_s16, 3 }
  0x58   : > { %v612_v2 = vld [vmem:[%s921_s22] sm:$0xff]   ;;  %535 = vmatprep.subr.bf16.mxu0 %v611_v1  ;;  %v614_v4 = vld [vmem:[%s921_s22 + $0x8] sm:$0xff]   ;;  %v616_v6 = vld [vmem:[%s921_s22 + $0x10] sm:$0xff]  }
  0x59   : > { %536 = vmatpush3.bf16.msra.mxu0 %v612_v2  ;;  %v617_v7 = vld [vmem:[%s921_s22 + $0x58] sm:$0xff]   ;;  %v619_v9 = vld [vmem:[%s921_s22 + $0x60] sm:$0xff]   ;;  %v621_v11 = vld [vmem:[%s921_s22 + $0x68] sm:$0xff]  }
  0x5a   : > { %537 = vmatprep.subr.bf16.mxu0 %v613_v3  ;;  %v618_v8 = vld [vmem:[%s921_s22 + $0x18] sm:$0xff]   ;;  %v620_v10 = vld [vmem:[%s921_s22 + $0x20] sm:$0xff]   ;;  %v622_v14 = vld [vmem:[%s921_s22 + $0x28] sm:$0xff]  }
  0x5b   : > { %v225_v12 = vld [vmem:[%s915_s29 + $0x8] sm:$0xff]  ;;  %v623_v15 = vld [vmem:[%s921_s22 + $0x70] sm:$0xff]   ;;  %v223_v22 = vld [vmem:[#allocation7] sm:$0xff] }
  0x5c   : > { %v227_v13 = vpack.c.bf16 %v225_v12, %v225_v12  ;;  %v624_v16 = vld [vmem:[%s921_s22 + $0x30] sm:$0xff]   ;;  %v625_v17 = vld [vmem:[%s921_s22 + $0x78] sm:$0xff]   ;;  %v528_v29 = vld [vmem:[%s988_s2] ss:$0 sm:$0xff] (!%p527_p12) }
  0x5d   : > { %538 = vmatpush3.bf16.msra.mxu0 %v614_v4  ;;  %v626_v18 = vld [vmem:[%s921_s22 + $0x38] sm:$0xff]   ;;  %v224_v19 = vld [vmem:[%s915_s29] sm:$0xff] }
  0x5e   : > { %539 = vmatprep.subr.bf16.mxu0 %v615_v5  ;;  %388 = vmatprep.mubr.bf16.mxu0 %v227_v13  ;;  %v226_v20 = vpack.c.bf16 %v224_v19, %v224_v19 }
  0x61   : > { %540 = vmatpush3.bf16.msra.mxu0 %v616_v6 }
  0x62   : > { %541 = vmatprep.subr.bf16.mxu0 %v617_v7 }
  0x65   : > { %542 = vmatpush3.bf16.msra.mxu0 %v618_v8 }
  0x66   : > { %543 = vmatprep.subr.bf16.mxu0 %v619_v9 }
  0x69   : > { %544 = vmatpush3.bf16.msra.mxu0 %v620_v10 }
  0x6a   : > { %545 = vmatprep.subr.bf16.mxu0 %v621_v11 }
  0x6d   : > { %546 = vmatpush3.bf16.msra.mxu0 %v622_v14 }
  0x6e   : > { %547 = vmatprep.subr.bf16.mxu0 %v623_v15 }
  0x71   : > { %548 = vmatpush3.bf16.msra.mxu0 %v624_v16 }
  0x72   : > { %549 = vmatprep.subr.bf16.mxu0 %v625_v17 }
  0x75   : > { %550 = vmatpush3.bf16.msra.mxu0 %v626_v18 }
  0x78   : > { %389 = vmatmul.mubr.bf16.vlgmr.msra.gmra.mrb[0].mxu0 %v226_v20 }
 0x14b   : > { %v551_v21 = vpop.f32.mrb[0].mxu0  ;;  %401 = sbr.rel (%p527_p12) target bundleno = 507 (0x1fb), region = 48 }
 0x14c   : > { %v552_v23 = vpop.f32.mrb[1].mxu0 }
 0x14d   : > { %v553_v24 = vadd.f32 %v552_v23, %v551_v21  ;;  %v554_v25 = vpop.f32.mrb[2].mxu0 }
 0x14e   : > { %v555_v26 = vpop.f32.mrb[3].mxu0 }
 0x14f   : > { %v396_v27 = vadd.f32 %v553_v24, %v223_v22 }
 0x151   : > { %397 = vst [vmem:[#allocation7] sm:$0xff] %v396_v27 }
 0x158   : > { %v402_v28 = vld [vmem:[#allocation7] sm:$0xff] }
 0x159   : > { %v410_v30 = vadd.f32 %v528_v29, %v402_v28 }
 0x15b   : > { %v411_v31 = vmul.f32 %v410_v30, %v410_v30 }
 0x15d   : > { %412 = vadd.xlane.f32.xlu0 %v411_v31 }
 0x1ea   : > { %v413_v32 = vpop.xlane.xlu0 %412 }
 0x1eb   : > { %v414_v33 = vadd.f32 1e-12, %v413_v32 }
 0x1ed   : > { %627 = vrsqrt.f32 %v414_v33 }
 0x1f7   : > { %v628_v34 = vpop.eup %627 }
 0x1f8   : > { %v416_v35 = vmul.f32 %v628_v34, %v410_v30 }
 0x1fa   : > { %417 = vst [vmem:[#allocation7] sm:$0xff] %v416_v35 }
 0x1fb PF: > { %p573_p5 = scmp.eq.s32.totalorder %s804_s16, 3  ;;  %s764_s5 = smov [#allocation7]  }
 0x1fc   : > { %s425_s7 = sshll.u32 %s764_s5, 4  ;;  %s426_s7 = int_to_ptr.vmem [resolvable:$true] %s425_s7 }
 0x1fd   : > { %s689_s27 = scalar_lea.vmem %s426_s7, 128  ;;  %p696_p0 = scmp.lt.s32.totalorder %s426_s7, %s426_s7 }
 0x1fe   : > { %p690_p6 = scmp.ne.s32.totalorder %s426_s7, %s689_s27  ;;  %p697_p4 = scmp.lt.s32.totalorder %s689_s27, %s689_s27 }
 0x200   : > { %p691_p2 = pnand %p690_p6, %p573_p5  ;;  %p698_p9 = por %p697_p4, %p696_p0 }
 0x202   : > { %p692_p3 = pneg %p691_p2 }
 0x204   : > { %p699_p10 = pnand %p698_p9, %p692_p3 }
 0x206   : > { %702 = shalt.err (!%p699_p10)
}
 0x207   : > { %s703_s9 = scalar_lea.hbm %s989_s3, 128 }
 0x208   : > { %p704_p11 = scmp.ne.s32.totalorder %s989_s3, %s703_s9  ;;  %p709_p7 = scmp.lt.u32.totalorder %s703_s9, %s989_s3 }
 0x20a   : > { %p705_p13 = pnand %p704_p11, %p573_p5 }
 0x20c   : > { %p706_p1 = pneg %p705_p13 }
 0x20e   : > { %p711_p8 = pnand %p709_p7, %p706_p1 }
 0x210   : > { %714 = shalt.err (!%p711_p8)
}
 0x211   : > { %562 = dma.vmem_to_hbm [thread:$0]  (%p573_p5), %s426_s7, 128, %s989_s3, [#allocation4]  }
 0x212   : > { %740 = dma.done.wait (%p573_p5), [#allocation4], 128  }
 0x213   : > { %742 = vsyncadd (%p573_p5), [#allocation4], 4294967168 }
 0x214 PF: > { %p17_p12 = scmp.ge.s32.totalorder %s807_s17, 6   ;;  %s997_s12 = smov %s749_s13 }
 0x215   : > { %s998_s13 = smov %s753_s14  ;;  %s999_s14 = smov %s817_s20 }
 0x216   : > { %s1000_s15 = smov %s807_s17  ;;  %19 = sbr.rel (!%p17_p12) target bundleno = 6 (0x6), region = 90 }
 0x21d   :  { %438 = vsyncpa [#allocation3], 1 }
 0x21e   :  { %440 = vsyncpa [#allocation3 + $0x1], 1 }
 0x21f   :  { %441 = vsyncpa [#allocation6], 1 }
 0x220   :  { %443 = vsyncpa [#allocation6 + $0x1], 1 }
 0x221   :  { %444 = vsyncpa [#allocation4], 1 }
 0x222   :  { %446 = vsyncpa [#allocation4 + $0x1], 1 }

</bundles_post_ra>
